<compile_context>
chip_gen: v5e
topology: v5e:2x2
jax: 0.10.0
libtpu: 0.0.40
codegen_flags: <defaults>
</compile_context>

<pallas_src>
import jax
import jax.numpy as jnp
from jax.experimental import pallas as pl
from jax.experimental.pallas import tpu as pltpu

_LANE = 128


def _pad_to(n, m):
    return ((n + m - 1) // m) * m


def _vmem_cap():
    # Per-generation VMEM budget: ~80% of physical, >=12 MiB headroom for Mosaic
    # internal scratch/semaphores. v7x (64 MiB) -> ~51 MiB; v5e/v6e (128) -> ~102.
    try:
        phys = pltpu.get_tpu_info().vmem_capacity_bytes
    except Exception:
        phys = 64 << 20  # conservative (v7x-sized) fallback
    return max(32 << 20, min(int(0.8 * phys), phys - (12 << 20)))


# ---------------------------------------------------------------------------
# Kernel 1: per-node feature transform   T = X @ W        (bf16 in, bf16 out)
# ---------------------------------------------------------------------------
def _transform_kernel(x_ref, w_ref, o_ref):
    o_ref[...] = jnp.dot(
        x_ref[...], w_ref[...], preferred_element_type=jnp.float32
    ).astype(o_ref.dtype)


def _transform(x, w, *, tm, vmem_cap):
    n_pad, f_in = x.shape
    f_out = w.shape[1]
    need = 2 * tm * f_in * 2 + 2 * f_in * f_out * 2 + 2 * tm * f_out * 2
    vmem = min(vmem_cap, max(need + (4 << 20), 16 << 20))
    return pl.pallas_call(
        _transform_kernel,
        out_shape=jax.ShapeDtypeStruct((n_pad, f_out), jnp.bfloat16),
        grid_spec=pltpu.PrefetchScalarGridSpec(
            num_scalar_prefetch=0,
            grid=(n_pad // tm,),
            in_specs=[
                pl.BlockSpec((tm, f_in), lambda i: (i, 0)),
                pl.BlockSpec((f_in, f_out), lambda i: (0, 0)),  # W resident
            ],
            out_specs=pl.BlockSpec((tm, f_out), lambda i: (i, 0)),
        ),
        compiler_params=pltpu.CompilerParams(
            dimension_semantics=("parallel",),
            vmem_limit_bytes=vmem,
        ),
    )(x, w)


# ---------------------------------------------------------------------------
# Kernel 2: aggregation (+ optional fused next-layer transform)
#   grid = (row tiles [parallel], A-column tiles [reduction, arbitrary])
#   acc += A_tile @ T_block ; epilogue: relu(acc + b) [@ W_next]
# ---------------------------------------------------------------------------
def _make_aggregate_kernel(tk, t_resident, fuse_next):
    align = tk & -tk  # largest power-of-two factor of tk (alignment hint)

    def kernel(*refs):
        if fuse_next:
            a_ref, t_ref, b_ref, w_ref, o_ref, acc_ref = refs
        else:
            a_ref, t_ref, b_ref, o_ref, acc_ref = refs
        k = pl.program_id(1)

        @pl.when(k == 0)
        def _():
            acc_ref[...] = jnp.zeros_like(acc_ref)

        if t_resident:
            off = pl.multiple_of(k * tk, align)
            t_blk = t_ref[pl.ds(off, tk), :]     # slice resident T (VMEM, no HBM)
        else:
            t_blk = t_ref[...]                   # streamed fallback
        acc_ref[...] += jnp.dot(a_ref[...], t_blk,
                                preferred_element_type=jnp.float32)

        @pl.when(k == pl.num_programs(1) - 1)
        def _():
            h = jnp.maximum(acc_ref[...] + b_ref[...], 0.0)  # f32 epilogue
            if fuse_next:
                # next-layer feature transform rides on the otherwise idle MXU
                o_ref[...] = jnp.dot(
                    h.astype(jnp.bfloat16), w_ref[...],
                    preferred_element_type=jnp.float32,
                ).astype(o_ref.dtype)
            else:
                o_ref[...] = h.astype(o_ref.dtype)

    return kernel


def _aggregate(a, t, b, w_next, *, tm, tk, out_dtype, vmem_cap):
    n_rows, n_cols = a.shape
    f = t.shape[1]
    fuse_next = w_next is not None
    f_out = w_next.shape[1] if fuse_next else f
    out_isz = jnp.dtype(out_dtype).itemsize

    # VMEM accounting (x2 = double buffers)
    a_bytes = 2 * tm * tk * 2
    b_bytes = 2 * f * 4
    w_bytes = 2 * f * f_out * 2 if fuse_next else 0
    o_bytes = 2 * tm * f_out * out_isz
    acc_bytes = tm * f * 4
    t_res_bytes = 2 * n_cols * f * 2
    t_str_bytes = 2 * tk * f * 2

    base = a_bytes + b_bytes + w_bytes + o_bytes + acc_bytes + (4 << 20)
    t_resident = (base + t_res_bytes) <= vmem_cap
    t_bytes = t_res_bytes if t_resident else t_str_bytes
    vmem = min(vmem_cap, max(base + t_bytes + (4 << 20), 32 << 20))

    if t_resident:
        # whole-array spec: constant block index -> T is DMA'd from HBM only once
        t_spec = pl.BlockSpec((n_cols, f), lambda i, k: (0, 0))
    else:
        t_spec = pl.BlockSpec((tk, f), lambda i, k: (k, 0))

    in_specs = [
        pl.BlockSpec((tm, tk), lambda i, k: (i, k)),   # A_hat tile (bf16 stream)
        t_spec,                                        # transformed features
        pl.BlockSpec((1, f), lambda i, k: (0, 0)),     # bias (resident)
    ]
    args = [a, t, b]
    if fuse_next:
        in_specs.append(pl.BlockSpec((f, f_out), lambda i, k: (0, 0)))  # W_next
        args.append(w_next)

    return pl.pallas_call(
        _make_aggregate_kernel(tk, t_resident, fuse_next),
        out_shape=jax.ShapeDtypeStruct((n_rows, f_out), out_dtype),
        grid_spec=pltpu.PrefetchScalarGridSpec(
            num_scalar_prefetch=0,
            grid=(n_rows // tm, n_cols // tk),
            in_specs=in_specs,
            out_specs=pl.BlockSpec((tm, f_out), lambda i, k: (i, 0)),
            scratch_shapes=[pltpu.VMEM((tm, f), jnp.float32)],
        ),
        compiler_params=pltpu.CompilerParams(
            dimension_semantics=("parallel", "arbitrary"),
            vmem_limit_bytes=vmem,
        ),
    )(*args)


# ---------------------------------------------------------------------------
# Wrapper: pad, cast, run the 2-layer encoder, slice back
# ---------------------------------------------------------------------------
def gcn_encoder(a_hat, x, w1, b1, w2, b2, *, tm=512, tk=2048):
    n, f_in = x.shape
    h1 = w1.shape[1]
    h2 = w2.shape[1]

    f_in_p = _pad_to(f_in, _LANE)
    h1_p = _pad_to(h1, _LANE)
    h2_p = _pad_to(h2, _LANE)

    # Legalize tiles: multiples of 128, tk a multiple of tm, clamped to graph size.
    n128 = _pad_to(n, _LANE)
    tm = max(_LANE, min((tm // _LANE) * _LANE, n128))
    tk = max(tm, min((tk // tm) * tm, _pad_to(n, tm)))

    # Decoupled padding: rows to a multiple of tm, cols (= T rows) to a multiple
    # of tk. Waste bounded by <1 tile per axis (no LCM blow-up).
    n_rows_pad = _pad_to(n, tm)
    n_cols_pad = _pad_to(n, tk)

    vmem_cap = _vmem_cap()
    f32, bf16 = jnp.float32, jnp.bfloat16

    def pad2(arr, shape, dtype):
        out = jnp.zeros(shape, dtype)
        return out.at[: arr.shape[0], : arr.shape[1]].set(arr.astype(dtype))

    a_p = pad2(a_hat, (n_rows_pad, n_cols_pad), bf16)  # bf16 halves A_hat traffic
    x_p = pad2(x, (n_cols_pad, f_in_p), bf16)
    w1_p = pad2(w1, (f_in_p, h1_p), bf16)
    w2_p = pad2(w2, (h1_p, h2_p), bf16)
    b1_p = pad2(b1.reshape(1, -1), (1, h1_p), f32)
    b2_p = pad2(b2.reshape(1, -1), (1, h2_p), f32)

    # layer 1 + fused layer-2 feature transform:
    #   T2 = relu(A_hat @ (X W1) + b1) @ W2   (H1 never written to HBM)
    t1 = _transform(x_p, w1_p, tm=tm, vmem_cap=vmem_cap)
    t2 = _aggregate(a_p, t1, b1_p, w2_p, tm=tm, tk=tk, out_dtype=bf16,
                    vmem_cap=vmem_cap)

    # NOTE: padded rows of T2 (rows >= n) hold relu(b1) @ W2, which is nonzero
    # when b1 != 0. They are annihilated by A_hat's zero padding columns in the
    # layer-2 aggregate and by the final [:n] slice — keep both invariants.
    if n_cols_pad > n_rows_pad:
        t2 = jnp.concatenate(
            [t2, jnp.zeros((n_cols_pad - n_rows_pad, h2_p), bf16)], axis=0)
    elif n_cols_pad < n_rows_pad:
        t2 = t2[:n_cols_pad]

    # layer 2: relu(A_hat @ T2 + b2)
    out = _aggregate(a_p, t2, b2_p, None, tm=tm, tk=tk, out_dtype=f32,
                     vmem_cap=vmem_cap)
    return out[:n, :h2]


# ---------------------------------------------------------------------------
# Glue: dense normalized adjacency from edge_index (plain JAX)
# ---------------------------------------------------------------------------
def build_normalized_adjacency(edge_index, num_nodes):
    src, dst = edge_index[0], edge_index[1]
    a = jnp.zeros((num_nodes, num_nodes), jnp.float32)
    a = a.at[dst, src].add(1.0)                              # messages src -> dst
    a = a + jnp.eye(num_nodes, dtype=jnp.float32)            # self loops
    deg = a.sum(axis=1)
    dinv = jnp.where(deg > 0, 1.0 / jnp.sqrt(deg), 0.0)
    return dinv[:, None] * a * dinv[None, :]


def glorot(key, fan_in, fan_out):
    limit = jnp.sqrt(6.0 / (fan_in + fan_out))
    return jax.random.uniform(key, (fan_in, fan_out), jnp.float32, -limit, limit)


if __name__ == "__main__":
    key = jax.random.PRNGKey(0)
    k_x, k_w1, k_w2, k_b1, k_b2 = jax.random.split(key, 5)

    # small shapes: N nodes, in_channels, hidden (= Encoder out_channels)
    N, IN_CH, HIDDEN = 300, 32, 8

    x = jax.random.normal(k_x, (N, IN_CH), jnp.float32)

    # deterministic symmetric ring graph edge_index [2, E]
    nodes = jnp.arange(N)
    nxt = (nodes + 1) % N
    src = jnp.concatenate([nodes, nxt])
    dst = jnp.concatenate([nxt, nodes])
    edge_index = jnp.stack([src, dst]).astype(jnp.int32)

    # GCNConv parameters (layer1: IN -> 2*HIDDEN, layer2: 2*HIDDEN -> HIDDEN)
    w1 = glorot(k_w1, IN_CH, 2 * HIDDEN)
    b1 = 0.1 * jax.random.normal(k_b1, (1, 2 * HIDDEN), jnp.float32)
    w2 = glorot(k_w2, 2 * HIDDEN, HIDDEN)
    b2 = 0.1 * jax.random.normal(k_b2, (1, HIDDEN), jnp.float32)

    a_hat = build_normalized_adjacency(edge_index, N)

    # small tiles for the small demo graph so both grid axes, resident-T slicing
    # and decoupled row/col padding (384 rows vs 512 cols) are all exercised
    out = gcn_encoder(a_hat, x, w1, b1, w2, b2, tm=128, tk=256)
    jax.block_until_ready(out)
    assert out.shape == (N, HIDDEN)

    # plain-JAX f32 reference (generous tolerance for bf16 matmul inputs)
    h_ref = jnp.maximum(a_hat @ (x @ w1) + b1, 0.0)
    ref = jnp.maximum(a_hat @ (h_ref @ w2) + b2, 0.0)
    assert jnp.allclose(out, ref, atol=1e-1, rtol=1e-1), float(
        jnp.max(jnp.abs(out - ref))
    )

    print("KERNEL_OK")
</pallas_src>

<mosaic_0001>
module attributes {stable_mosaic.version = 11 : i64} {
  func.func @_transform_kernel(%arg0: i32, %arg1: memref<128x128xbf16, #tpu.memory_space<vmem>>, %arg2: memref<128x128xbf16, #tpu.memory_space<vmem>>, %arg3: memref<128x128xbf16, #tpu.memory_space<vmem>>) attributes {dimension_semantics = [#tpu.dimension_semantics<parallel>], iteration_bounds = array<i64: 4>, scalar_prefetch = 0 : i64, scratch_operands = 0 : i64, tpu.core_type = #tpu.core_type<tc>, window_params = [{transform_indices = @transform_0, window_bounds = array<i64: 128, 128>}, {pipeline_mode = #tpu.pipeline_mode<synchronous>, transform_indices = @transform_1, window_bounds = array<i64: 128, 128>}, {transform_indices = @transform_2, window_bounds = array<i64: 128, 128>}]} {
    %c0 = arith.constant 0 : index
    %c0_0 = arith.constant 0 : index
    %0 = vector.load %arg1[%c0, %c0_0] : memref<128x128xbf16, #tpu.memory_space<vmem>>, vector<128x128xbf16>
    %c0_1 = arith.constant 0 : index
    %c0_2 = arith.constant 0 : index
    %1 = vector.load %arg2[%c0_1, %c0_2] : memref<128x128xbf16, #tpu.memory_space<vmem>>, vector<128x128xbf16>
    %cst = arith.constant dense<0.000000e+00> : vector<128x128xf32>
    %2 = tpu.matmul %0, %1, %cst {dimension_numbers = #tpu.dot_dimension_numbers<[1], [0], [0], [1], [0, 0, 1, 1], [], []>} : vector<128x128xbf16>, vector<128x128xbf16>, vector<128x128xf32> -> vector<128x128xf32>
    %3 = arith.truncf %2 : vector<128x128xf32> to vector<128x128xbf16>
    %c0_3 = arith.constant 0 : index
    %c0_4 = arith.constant 0 : index
    %4 = vector.load %arg3[%c0_3, %c0_4] : memref<128x128xbf16, #tpu.memory_space<vmem>>, vector<128x128xbf16>
    tpu.vector_store %arg3[%c0_3, %c0_4], %3 {strides = array<i32>} : memref<128x128xbf16, #tpu.memory_space<vmem>>, vector<128x128xbf16>,
    return
  }
  func.func @transform_0(%arg0: i32) -> (i32, i32) {
    %c0_i32 = arith.constant 0 : i32
    %c0_i32_0 = arith.constant 0 : i32
    return %arg0, %c0_i32 : i32, i32
  }
  func.func @transform_1(%arg0: i32) -> (i32, i32) {
    %c0_i32 = arith.constant 0 : i32
    %c0_i32_0 = arith.constant 0 : i32
    %c0_i32_1 = arith.constant 0 : i32
    return %c0_i32, %c0_i32_0 : i32, i32
  }
  func.func @transform_2(%arg0: i32) -> (i32, i32) {
    %c0_i32 = arith.constant 0 : i32
    %c0_i32_0 = arith.constant 0 : i32
    return %arg0, %c0_i32 : i32, i32
  }
}

</mosaic_0001>

<bundles_post_ra>
// kernel: tpu_custom_call.1
= control target key start
LH: loop header
LB: loop body
LE: loop exit
PB: predicated region body
PF: predicated region fallthrough
CT: control target
= control target key end

     0   :  { %7 = vsyncpa [#allocation3], 0  ;;  %s1029_s0 = inlined_call_operand.hbm [shape: bf16[512,128], index: 0, kind: input, shape index: {}]   ;;  %s1030_s1 = inlined_call_operand.hbm [shape: bf16[128,128], index: 1, kind: input, shape index: {}]   ;;  %s1031_s2 = inlined_call_operand.hbm [shape: bf16[512,128], index: 2, kind: output, shape index: {}]  }
   0x1   :  { %9 = vsyncpa [#allocation3 + $0x1], 0 }
   0x2   :  { %10 = vsyncpa [#allocation6], 0 }
   0x3   :  { %11 = vsyncpa [#allocation4], 0 }
   0x4   :  { %13 = vsyncpa [#allocation4 + $0x1], 0  ;;  %s873_s9 = smov 0   ;;  %s875_s10 = smov 0  }
   0x5   :  { %s877_s11 = smov 0   ;;  %s879_s12 = smov 0  }
   0x6 LB: > { %s894_s13 = sadd.s32 4294967295, %s851_s12   ;;  %s491_s14 = sadd.s32 4294967294, %s851_s12   ;;  %s851_s12 = sphi %s879_s12, %s1040_s12   ;;  %s847_s11 = sphi %s877_s11, %s1039_s11   ;;  %s843_s10 = sphi %s875_s10, %s1038_s10   ;;  %s839_s9 = sphi %s873_s9, %s1037_s9  }
   0x7   : > { %p39_p0 = scmp.ne.s32.totalorder %s843_s10, %s839_s9  ;;  %p40_p1 = scmp.eq.s32.totalorder %s894_s13, 0 }
   0x8   : > { %p84_p2 = scmp.eq.s32.totalorder %s894_s13, 3  ;;  %p90_p3 = scmp.eq.s32.totalorder %s491_s14, 3 }
   0x9   : > { %p903_p4 = por %p40_p1, %p39_p0  ;;  %p492_p5 = scmp.ge.s32.totalorder %s851_s12, 1 }
   0xa   : > { %p908_p6 = por %p90_p3, %p39_p0  ;;  %p97_p7 = scmp.lt.s32.totalorder %s851_s12, 5 }
   0xb   : > { %s108_s19 = sshll.u32 %s1030_s1, 4  ;;  %s853_s21 = smov [#allocation5]   ;;  %s109_s19 = int_to_ptr.hbm [resolvable:$true] %s108_s19 }
   0xc   : > { %p916_p8 = pnand %p492_p5, %p97_p7  ;;  %s110_s22 = sshll.u32 %s853_s21, 4  ;;  %s111_s22 = int_to_ptr.vmem [resolvable:$true] %s110_s22 }
   0xd   : > { %s925_s23 = sadd.s32 1, %s851_s12   ;;  %s854_s24 = smov 64  }
   0xe   : > { %p668_p9 = pneg %p916_p8  ;;  %s855_s25 = smov 4  }
   0xf   : > { %s23_s26 = ssub.s32 %s851_s12, %s925_s23  ;;  %s26_s27 = sadd.s32 1, %s847_s11 }
  0x10   : > { %p669_p10 = pnand %p668_p9, %p40_p1  ;;  %p24_p11 = scmp.eq.s32.totalorder %s23_s26, 0 }
  0x11   : > { %p33_p12 = scmp.ne.s32.totalorder %s847_s11, %s843_s10  ;;  %p34_p13 = scmp.eq.s32.totalorder %s851_s12, 0 }
  0x12   : > { %671 = dma.hbm_to_vmem [thread:$0]  (!%p669_p10), %s109_s19, 1024, %s111_s22, [#allocation6], %s854_s24, %s854_s24, %s855_s25  }
  0x13   : > { %s937_s28 = scalar_select %p24_p11, %s847_s11, %s26_s27  }
  0x14   : > { %p941_p0 = por %p84_p2, %p33_p12  ;;  %p681_p3 = scmp.lt.s32.totalorder %s851_s12, 4 }
  0x15   : > { %s124_s30 = sand.u32 1, %s847_s11   ;;  %s571_s3 = sshll.u32 %s851_s12, 6 }
  0x16   : > { %p35_p5 = por %p34_p13, %p33_p12  ;;  %s495_s4 = sshll.u32 %s124_s30, 6 }
  0x17   : > { %s133_s7 = scalar_lea.hbm %s1029_s0, %s571_s3  ;;  %s128_s14 = scalar_lea.vmem [#allocation2], %s495_s4 }
  0x18   : > { %s134_s8 = sshll.u32 %s133_s7, 4  ;;  %s136_s17 = sshll.u32 %s128_s14, 4  ;;  %s135_s8 = int_to_ptr.hbm [resolvable:$true] %s134_s8  ;;  %s137_s17 = int_to_ptr.vmem [resolvable:$true] %s136_s17 }
  0x19   : > { %p951_p7 = pnand %p681_p3, %p35_p5  ;;  %s125_s19 = scalar_lea.sflag [#allocation3], %s124_s30 }
  0x1a   : > { %s751_s21 = sshra.s32 %s135_s8, 4  ;;  %s758_s3 = scalar_lea.hbm %s1029_s0, 256  ;;  %s752_s21 = int_to_ptr.hbm [resolvable:$true] %s751_s21 }
  0x1b   : > { %s753_s22 = scalar_lea.hbm %s752_s21, 64  ;;  %p755_p9 = pneg %p951_p7 }
  0x1c   : > { %p754_p2 = scmp.ne.s32.totalorder %s752_s21, %s753_s22  ;;  %p759_p12 = scmp.lt.s32.totalorder %s752_s21, %s1029_s0 }
  0x1d   : > { %p760_p13 = scmp.lt.s32.totalorder %s758_s3, %s753_s22 }
  0x1e   : > { %p756_p10 = pnand %p755_p9, %p754_p2 }
  0x1f   : > { %p761_p3 = por %p760_p13, %p759_p12 }
  0x20   : > { %p757_p11 = pneg %p756_p10 }
  0x22   : > { %p762_p5 = pnand %p761_p3, %p757_p11 }
  0x24   : > { %765 = shalt.err (!%p762_p5)
}
  0x25   : > { %675 = dma.hbm_to_vmem [thread:$0]  (!%p951_p7), %s135_s8, 1024, %s137_s17, %s125_s19, %s854_s24, %s854_s24, %s855_s25  }
  0x26   : > { %148 = sbr.rel (%p916_p8) target bundleno = 242 (0xf2), region = 28  ;;  %s971_s30 = sand.u32 (!%p916_p8), 1, %s843_s10  }
  0x27   : > { %s499_s6 = sshll.u32 (!%p916_p8), %s971_s30, 6  ;;  %s151_s7 = scalar_lea.sflag (!%p916_p8), [#allocation3], %s971_s30 }
  0x28   : > { %s977_s14 = scalar_lea.vmem (!%p916_p8), [#allocation2], %s499_s6 }
  0x2b   : > { %826 = dma.done.wait (%p903_p4), %s151_s7, 1024  }
  0x2c   : > { %828 = vsyncadd (%p903_p4), %s151_s7, 4294966272 }
  0x2d   : > { %830 = dma.done.wait (%p40_p1), [#allocation6], 1024  }
  0x2e   : > { %832 = vsyncadd (%p40_p1), [#allocation6], 4294966272  ;;  %v587_v0 = vld [vmem:[#allocation5 + $0x38] sm:$0xff]  ;;  %v586_v1 = vld [vmem:[#allocation5 + $0x30] sm:$0xff]  ;;  %s180_s15 = scalar_lea.vmem [#allocation7], %s499_s6  ;;  %s588_s20 = sshll.u32 %s894_s13, 6 }
  0x2f   : > { %311 = vmatpush.bf16.msra.mxu0 %v587_v0  ;;  %636 = vmatpush.bf16.msra.mxu1 %v587_v0  ;;  %v585_v2 = vld [vmem:[#allocation5 + $0x28] sm:$0xff]  ;;  %v584_v3 = vld [vmem:[#allocation5 + $0x20] sm:$0xff]  ;;  %v583_v4 = vld [vmem:[#allocation5 + $0x18] sm:$0xff]  ;;  %s404_s8 = scalar_lea.hbm %s1031_s2, %s588_s20  ;;  %s405_s17 = sshll.u32 %s180_s15, 4  ;;  %s406_s17 = int_to_ptr.vmem [resolvable:$true] %s405_s17 }
  0x30   : > { %637 = vmatpush.bf16.msra.mxu2 %v587_v0  ;;  %638 = vmatpush.bf16.msra.mxu3 %v587_v0  ;;  %v582_v5 = vld [vmem:[#allocation5 + $0x10] sm:$0xff]  ;;  %v581_v6 = vld [vmem:[#allocation5 + $0x8] sm:$0xff]  ;;  %v580_v7 = vld [vmem:[#allocation5] sm:$0xff]  ;;  %s407_s18 = sshll.u32 %s404_s8, 4  ;;  %s393_s13 = scalar_lea.sflag [#allocation4], %s971_s30  ;;  %s408_s18 = int_to_ptr.hbm [resolvable:$true] %s407_s18 }
  0x31   : > { %v572_v8 = vld [vmem:[%s977_s14] sm:$0xff]  ;;  %v574_v9 = vld [vmem:[%s977_s14 + $0x10] sm:$0xff]  ;;  %v573_v12 = vld [vmem:[%s977_s14 + $0x8] sm:$0xff]  ;;  %s795_s19 = sshra.s32 %s408_s18, 4  ;;  %s801_s27 = scalar_lea.hbm %s1031_s2, 256  ;;  %s796_s19 = int_to_ptr.hbm [resolvable:$true] %s795_s19 }
  0x32   : > { %v576_v10 = vld [vmem:[%s977_s14 + $0x20] sm:$0xff]  ;;  %v578_v11 = vld [vmem:[%s977_s14 + $0x30] sm:$0xff]  ;;  %v575_v13 = vld [vmem:[%s977_s14 + $0x18] sm:$0xff]  ;;  %s797_s21 = scalar_lea.hbm %s796_s19, 64  ;;  %p802_p7 = scmp.lt.s32.totalorder %s796_s19, %s1031_s2 }
  0x33   : > { %312 = vmatpush.bf16.msra.mxu0 %v586_v1  ;;  %639 = vmatpush.bf16.msra.mxu1 %v586_v1  ;;  %v577_v14 = vld [vmem:[%s977_s14 + $0x28] sm:$0xff]  ;;  %v579_v15 = vld [vmem:[%s977_s14 + $0x38] sm:$0xff]  ;;  %p798_p1 = scmp.ne.s32.totalorder %s796_s19, %s797_s21  ;;  %p803_p2 = scmp.lt.s32.totalorder %s801_s27, %s797_s21 }
  0x34   : > { %640 = vmatpush.bf16.msra.mxu2 %v586_v1  ;;  %641 = vmatpush.bf16.msra.mxu3 %v586_v1 }
  0x35   : > { %p799_p4 = pnand %p798_p1, %p941_p0  ;;  %p804_p9 = por %p803_p2, %p802_p7 }
  0x37   : > { %313 = vmatpush.bf16.msra.mxu0 %v585_v2  ;;  %642 = vmatpush.bf16.msra.mxu1 %v585_v2  ;;  %p800_p8 = pneg %p799_p4 }
  0x38   : > { %643 = vmatpush.bf16.msra.mxu2 %v585_v2  ;;  %644 = vmatpush.bf16.msra.mxu3 %v585_v2 }
  0x39   : > { %p805_p10 = pnand %p804_p9, %p800_p8 }
  0x3b   : > { %314 = vmatpush.bf16.msra.mxu0 %v584_v3  ;;  %645 = vmatpush.bf16.msra.mxu1 %v584_v3 }
  0x3c   : > { %646 = vmatpush.bf16.msra.mxu2 %v584_v3  ;;  %647 = vmatpush.bf16.msra.mxu3 %v584_v3 }
  0x3f   : > { %315 = vmatpush.bf16.msra.mxu0 %v583_v4  ;;  %648 = vmatpush.bf16.msra.mxu1 %v583_v4 }
  0x40   : > { %649 = vmatpush.bf16.msra.mxu2 %v583_v4  ;;  %650 = vmatpush.bf16.msra.mxu3 %v583_v4 }
  0x43   : > { %316 = vmatpush.bf16.msra.mxu0 %v582_v5  ;;  %651 = vmatpush.bf16.msra.mxu1 %v582_v5 }
  0x44   : > { %652 = vmatpush.bf16.msra.mxu2 %v582_v5  ;;  %653 = vmatpush.bf16.msra.mxu3 %v582_v5 }
  0x47   : > { %317 = vmatpush.bf16.msra.mxu0 %v581_v6  ;;  %654 = vmatpush.bf16.msra.mxu1 %v581_v6 }
  0x48   : > { %655 = vmatpush.bf16.msra.mxu2 %v581_v6  ;;  %656 = vmatpush.bf16.msra.mxu3 %v581_v6 }
  0x4b   : > { %318 = vmatpush.bf16.msra.mxu0 %v580_v7  ;;  %657 = vmatpush.bf16.msra.mxu1 %v580_v7 }
  0x4c   : > { %658 = vmatpush.bf16.msra.mxu2 %v580_v7  ;;  %659 = vmatpush.bf16.msra.mxu3 %v580_v7 }
  0x4e   : > { %319 = vmatmul.bf16.vlgmr.msra.gmra.mxu0 %v572_v8  ;;  %329 = vmatmul.bf16.vlgmr.msra.gmra.mxu1 %v574_v9 }
  0x4f   : > { %339 = vmatmul.bf16.vlgmr.msra.gmra.mxu2 %v576_v10  ;;  %349 = vmatmul.bf16.vlgmr.msra.gmra.mxu3 %v578_v11 }
  0x5e   : > { %324 = vmatmul.bf16.gmra.mxu0 %v573_v12  ;;  %334 = vmatmul.bf16.gmra.mxu1 %v575_v13 }
  0x5f   : > { %344 = vmatmul.bf16.gmra.mxu2 %v577_v14  ;;  %354 = vmatmul.bf16.gmra.mxu3 %v579_v15 }
  0xcb   : > { %v320_v16 = vpop.f32.mrf.mxu0  ;;  %v330_v17 = vpop.f32.mrf.mxu1 }
  0xd2   : > { %v340_v18 = vpop.f32.mrf.mxu2  ;;  %v350_v19 = vpop.f32.mrf.mxu3 }
  0xd3   : > { %v322_v20 = vpop.f32.mrf.mxu0  ;;  %v332_v21 = vpop.f32.mrf.mxu1 }
  0xd4   : > { %v592_v22 = vpack.c.bf16 %v322_v20, %v320_v16  ;;  %v602_v23 = vpack.c.bf16 %v332_v21, %v330_v17 }
  0xd6   : > { %593 = vst [vmem:[%s180_s15] sm:$0xff] %v592_v22  }
  0xd7   : > { %630 = vst [vmem:[%s180_s15 + $0x10] sm:$0xff] %v602_v23  }
  0xda   : > { %v342_v24 = vpop.f32.mrf.mxu2  ;;  %v352_v25 = vpop.f32.mrf.mxu3 }
  0xdb   : > { %v612_v26 = vpack.c.bf16 %v342_v24, %v340_v18  ;;  %v622_v27 = vpack.c.bf16 %v352_v25, %v350_v19  ;;  %v325_v28 = vpop.f32.mrf.mxu0  ;;  %v335_v29 = vpop.f32.mrf.mxu1 }
  0xdd   : > { %632 = vst [vmem:[%s180_s15 + $0x20] sm:$0xff] %v612_v26  }
  0xde   : > { %634 = vst [vmem:[%s180_s15 + $0x30] sm:$0xff] %v622_v27  }
  0xe2   : > { %v345_v30 = vpop.f32.mrf.mxu2  ;;  %v355_v31 = vpop.f32.mrf.mxu3 }
  0xe3   : > { %v327_v32 = vpop.f32.mrf.mxu0  ;;  %v337_v33 = vpop.f32.mrf.mxu1 }
  0xe4   : > { %v597_v34 = vpack.c.bf16 %v327_v32, %v325_v28  ;;  %v607_v35 = vpack.c.bf16 %v337_v33, %v335_v29 }
  0xe6   : > { %629 = vst [vmem:[%s180_s15 + $0x8] sm:$0xff] %v597_v34  }
  0xe7   : > { %631 = vst [vmem:[%s180_s15 + $0x18] sm:$0xff] %v607_v35  }
  0xea   : > { %v347_v36 = vpop.f32.mrf.mxu2  ;;  %v357_v37 = vpop.f32.mrf.mxu3 }
  0xeb   : > { %v617_v38 = vpack.c.bf16 %v347_v36, %v345_v30  ;;  %v627_v39 = vpack.c.bf16 %v357_v37, %v355_v31 }
  0xed   : > { %633 = vst [vmem:[%s180_s15 + $0x28] sm:$0xff] %v617_v38  }
  0xee   : > { %635 = vst [vmem:[%s180_s15 + $0x38] sm:$0xff] %v627_v39  }
  0xef   : > { %808 = shalt.err (!%p805_p10)
}
  0xf0   : > { %s856_s5 = smov 64   ;;  %s857_s30 = smov 4  }
  0xf1   : > { %666 = dma.vmem_to_hbm [thread:$0]  (%p941_p0), %s406_s17, 1024, %s408_s18, %s393_s13, %s856_s5, %s856_s5, %s857_s30  }
  0xf2 PF: > { %p683_p11 = scmp.ge.s32.totalorder %s851_s12, 2  ;;  %s422_s6 = sand.u32 1, %s839_s9  }
  0xf3   : > { %s423_s7 = scalar_lea.sflag [#allocation4], %s422_s6 }
  0xf4   : > { %p677_p12 = pnand %p683_p11, %p908_p6 }
  0xf6   : > { %p678_p13 = pneg %p677_p12 }
  0xf8   : > { %834 = dma.done.wait (%p678_p13), %s423_s7, 1024  }
  0xf9   : > { %836 = vsyncadd (%p678_p13), %s423_s7, 4294966272  ;;  %p16_p3 = scmp.ge.s32.totalorder %s925_s23, 6   ;;  %s1037_s9 = smov %s843_s10 }
  0xfa   : > { %s1038_s10 = smov %s847_s11  ;;  %s1039_s11 = smov %s937_s28 }
  0xfb   : > { %s1040_s12 = smov %s925_s23  ;;  %18 = sbr.rel (!%p16_p3) target bundleno = 6 (0x6), region = 77 }
 0x100   :  { %429 = vsyncpa [#allocation3], 1 }
 0x101   :  { %431 = vsyncpa [#allocation3 + $0x1], 1 }
 0x102   :  { %432 = vsyncpa [#allocation6], 1 }
 0x103   :  { %433 = vsyncpa [#allocation4], 1 }
 0x104   :  { %435 = vsyncpa [#allocation4 + $0x1], 1 }

</bundles_post_ra>
